<compile_context>
chip_gen: v6e
topology: v6e:2x2x1
jax: 0.10.0
libtpu: 0.0.40
codegen_flags: <defaults>
</compile_context>

<pallas_src>
import functools

import jax
import jax.numpy as jnp
from jax.experimental import pallas as pl
from jax.experimental.pallas import tpu as pltpu

HIDDEN = 128


def _round_up(n, m):
    return ((n + m - 1) // m) * m


def mlp_kernel(x_ref, w_ref, b_ref, o_ref, *, feat):
    """x_ref: (bm, feat) f32; w_ref: (4,128,128) bf16; b_ref: (4,128) f32; o_ref: (bm,1) f32."""
    x = x_ref[...].astype(jnp.bfloat16)
    # fc1 + relu: real K = feat (static slice of the resident weight stack, zero-cost).
    h = jnp.dot(x, w_ref[0, :feat, :], preferred_element_type=jnp.float32)
    h = jnp.maximum(h + b_ref[0:1, :], 0.0)
    # TODO(synk): F.dropout(p=0.1) is identity in eval mode; training-mode RNG
    # masking (pltpu.prng_seed + prng_random_bits) is not reproduced here.
    # fc2 + relu
    h = jnp.dot(h.astype(jnp.bfloat16), w_ref[1], preferred_element_type=jnp.float32)
    h = jnp.maximum(h + b_ref[1:2, :], 0.0)
    # fc3 + relu
    h = jnp.dot(h.astype(jnp.bfloat16), w_ref[2], preferred_element_type=jnp.float32)
    h = jnp.maximum(h + b_ref[2:3, :], 0.0)
    # fc4: only the single real output column is computed and stored.
    y = jnp.dot(h.astype(jnp.bfloat16), w_ref[3, :, 0:1], preferred_element_type=jnp.float32)
    o_ref[...] = (y + b_ref[3:4, 0:1]).astype(o_ref.dtype)


def net_census_forward(x, packed_params, *, bm=None):
    """x: (B, input_shape + s_shape) float32 -> (B, 1) float32."""
    w_stack, b_stack = packed_params  # (4,128,128) bf16, (4,128) f32
    B, F = x.shape
    assert F <= HIDDEN, "feature dim must fit the packed 128-row fc1 weight"

    if bm is None:
        if B >= 16:
            # Big tiles amortize the ~0.35us per-grid-step overhead, but keep >= 2
            # grid steps so both v7x TensorCores get work.
            bm = min(1024, _round_up((B + 1) // 2, 8))
        else:
            bm = _round_up(B, 8)
    bm = _round_up(bm, 8)
    B_pad = _round_up(B, bm)

    # Only batch-dim padding (if needed); feature dim is read at its real width.
    x_in = jnp.pad(x, ((0, B_pad - B), (0, 0))) if B_pad != B else x

    grid = (B_pad // bm,)
    y = pl.pallas_call(
        functools.partial(mlp_kernel, feat=F),
        out_shape=jax.ShapeDtypeStruct((B_pad, 1), jnp.float32),
        grid=grid,
        in_specs=[
            pl.BlockSpec((bm, F), lambda i: (i, 0)),                 # x tile (pipelined)
            pl.BlockSpec((4, HIDDEN, HIDDEN), lambda i: (0, 0, 0)),  # weights (resident)
            pl.BlockSpec((4, HIDDEN), lambda i: (0, 0)),             # biases  (resident)
        ],
        out_specs=pl.BlockSpec((bm, 1), lambda i: (i, 0)),           # narrow real output
        compiler_params=pltpu.CompilerParams(
            dimension_semantics=("parallel",),  # batch tiles shard across v7x's 2 TCs
        ),
    )(x_in, w_stack, b_stack)

    # Padded batch rows (bias-derived garbage) are discarded here.
    return y[:B] if B_pad != B else y


def init_params(key, input_shape, s_shape=2):
    """PyTorch-Linear-style init: U(-1/sqrt(fan_in), 1/sqrt(fan_in)).
    Weights stored transposed (in, out) relative to nn.Linear's (out, in)."""
    dims = [(input_shape + s_shape, 128), (128, 128), (128, 128), (128, 1)]
    params = []
    for fan_in, fan_out in dims:
        key, kw, kb = jax.random.split(key, 3)
        bound = 1.0 / jnp.sqrt(jnp.float32(fan_in))
        w = jax.random.uniform(kw, (fan_in, fan_out), jnp.float32, -bound, bound)
        b = jax.random.uniform(kb, (fan_out,), jnp.float32, -bound, bound)
        params.append((w, b))
    return params


def pack_params(params):
    """Zero-pad every layer to (128,128)/(128,), stack, and cast weights to bf16."""
    ws, bs = [], []
    for w, b in params:
        w_p = jnp.zeros((HIDDEN, HIDDEN), jnp.float32).at[: w.shape[0], : w.shape[1]].set(w)
        b_p = jnp.zeros((HIDDEN,), jnp.float32).at[: b.shape[0]].set(b)
        ws.append(w_p)
        bs.append(b_p)
    return jnp.stack(ws).astype(jnp.bfloat16), jnp.stack(bs)


def reference_forward_f32(x, params):
    (w1, b1), (w2, b2), (w3, b3), (w4, b4) = params
    h = jnp.maximum(x @ w1 + b1, 0.0)
    h = jnp.maximum(h @ w2 + b2, 0.0)
    h = jnp.maximum(h @ w3 + b3, 0.0)
    return h @ w4 + b4


def reference_forward_bf16(x, params):
    """Mirrors the kernel's numerics: bf16 matmul inputs, f32 accumulation/bias/ReLU."""
    def lin(h, w, b):
        return jnp.dot(h.astype(jnp.bfloat16), w.astype(jnp.bfloat16),
                       preferred_element_type=jnp.float32) + b
    (w1, b1), (w2, b2), (w3, b3), (w4, b4) = params
    h = jnp.maximum(lin(x, w1, b1), 0.0)
    h = jnp.maximum(lin(h, w2, b2), 0.0)
    h = jnp.maximum(lin(h, w3, b3), 0.0)
    return lin(h, w4, b4)


if __name__ == "__main__":
    key = jax.random.PRNGKey(0)
    input_shape, s_shape = 30, 2   # feature dim = 32
    batch = 64                     # small, but exercises a 2-step pipelined grid

    kp, kx = jax.random.split(key)
    params = init_params(kp, input_shape, s_shape)
    packed = pack_params(params)
    x = jax.random.normal(kx, (batch, input_shape + s_shape), jnp.float32)

    y = net_census_forward(x, packed)   # default bm=32 -> grid=(2,)
    y = jax.block_until_ready(y)
    assert y.shape == (batch, 1)

    y_bf16_ref = reference_forward_bf16(x, params)
    y_f32_ref = reference_forward_f32(x, params)
    assert jnp.allclose(y, y_bf16_ref, atol=1e-4, rtol=1e-4), "mismatch vs bf16-mirrored reference"
    assert jnp.allclose(y, y_f32_ref, atol=5e-2, rtol=5e-2), "mismatch vs f32 reference"
    print("KERNEL_OK")
</pallas_src>

<mosaic_0001>
module attributes {stable_mosaic.version = 11 : i64} {
  func.func @mlp_kernel(%arg0: i32, %arg1: memref<32x32xf32, #tpu.memory_space<vmem>>, %arg2: memref<4x128x128xbf16, #tpu.memory_space<vmem>>, %arg3: memref<4x128xf32, #tpu.memory_space<vmem>>, %arg4: memref<32x1xf32, #tpu.memory_space<vmem>>) attributes {dimension_semantics = [#tpu.dimension_semantics<parallel>], iteration_bounds = array<i64: 2>, scalar_prefetch = 0 : i64, scratch_operands = 0 : i64, tpu.core_type = #tpu.core_type<tc>, window_params = [{transform_indices = @transform_0, window_bounds = array<i64: 32, 32>}, {pipeline_mode = #tpu.pipeline_mode<synchronous>, transform_indices = @transform_1, window_bounds = array<i64: 4, 128, 128>}, {pipeline_mode = #tpu.pipeline_mode<synchronous>, transform_indices = @transform_2, window_bounds = array<i64: 4, 128>}, {transform_indices = @transform_3, window_bounds = array<i64: 32, 1>}]} {
    %c0 = arith.constant 0 : index
    %c0_0 = arith.constant 0 : index
    %0 = vector.load %arg1[%c0, %c0_0] : memref<32x32xf32, #tpu.memory_space<vmem>>, vector<32x32xf32>
    %1 = arith.truncf %0 : vector<32x32xf32> to vector<32x32xbf16>
    %c0_1 = arith.constant 0 : index
    %c0_2 = arith.constant 0 : index
    %c0_3 = arith.constant 0 : index
    %2 = vector.load %arg2[%c0_1, %c0_2, %c0_3] : memref<4x128x128xbf16, #tpu.memory_space<vmem>>, vector<1x32x128xbf16>
    %3 = vector.shape_cast %2 : vector<1x32x128xbf16> to vector<32x128xbf16>
    %cst = arith.constant dense<0.000000e+00> : vector<32x128xf32>
    %4 = tpu.matmul %1, %3, %cst {dimension_numbers = #tpu.dot_dimension_numbers<[1], [0], [0], [1], [0, 0, 1, 1], [], []>} : vector<32x32xbf16>, vector<32x128xbf16>, vector<32x128xf32> -> vector<32x128xf32>
    %c0_4 = arith.constant 0 : index
    %c0_5 = arith.constant 0 : index
    %5 = vector.load %arg3[%c0_4, %c0_5] : memref<4x128xf32, #tpu.memory_space<vmem>>, vector<1x128xf32>
    %6 = vector.broadcast %5 : vector<1x128xf32> to vector<32x128xf32>
    %7 = arith.addf %4, %6 : vector<32x128xf32>
    %cst_6 = arith.constant 0.000000e+00 : f32
    %8 = vector.broadcast %cst_6 : f32 to vector<32x128xf32>
    %9 = arith.maximumf %7, %8 : vector<32x128xf32>
    %10 = arith.truncf %9 : vector<32x128xf32> to vector<32x128xbf16>
    %c1 = arith.constant 1 : index
    %c0_7 = arith.constant 0 : index
    %c0_8 = arith.constant 0 : index
    %11 = vector.load %arg2[%c1, %c0_7, %c0_8] : memref<4x128x128xbf16, #tpu.memory_space<vmem>>, vector<1x128x128xbf16>
    %12 = vector.shape_cast %11 : vector<1x128x128xbf16> to vector<128x128xbf16>
    %cst_9 = arith.constant dense<0.000000e+00> : vector<32x128xf32>
    %13 = tpu.matmul %10, %12, %cst_9 {dimension_numbers = #tpu.dot_dimension_numbers<[1], [0], [0], [1], [0, 0, 1, 1], [], []>} : vector<32x128xbf16>, vector<128x128xbf16>, vector<32x128xf32> -> vector<32x128xf32>
    %c1_10 = arith.constant 1 : index
    %c0_11 = arith.constant 0 : index
    %14 = vector.load %arg3[%c1_10, %c0_11] : memref<4x128xf32, #tpu.memory_space<vmem>>, vector<1x128xf32>
    %15 = vector.broadcast %14 : vector<1x128xf32> to vector<32x128xf32>
    %16 = arith.addf %13, %15 : vector<32x128xf32>
    %cst_12 = arith.constant 0.000000e+00 : f32
    %17 = vector.broadcast %cst_12 : f32 to vector<32x128xf32>
    %18 = arith.maximumf %16, %17 : vector<32x128xf32>
    %19 = arith.truncf %18 : vector<32x128xf32> to vector<32x128xbf16>
    %c2 = arith.constant 2 : index
    %c0_13 = arith.constant 0 : index
    %c0_14 = arith.constant 0 : index
    %20 = vector.load %arg2[%c2, %c0_13, %c0_14] : memref<4x128x128xbf16, #tpu.memory_space<vmem>>, vector<1x128x128xbf16>
    %21 = vector.shape_cast %20 : vector<1x128x128xbf16> to vector<128x128xbf16>
    %cst_15 = arith.constant dense<0.000000e+00> : vector<32x128xf32>
    %22 = tpu.matmul %19, %21, %cst_15 {dimension_numbers = #tpu.dot_dimension_numbers<[1], [0], [0], [1], [0, 0, 1, 1], [], []>} : vector<32x128xbf16>, vector<128x128xbf16>, vector<32x128xf32> -> vector<32x128xf32>
    %c2_16 = arith.constant 2 : index
    %c0_17 = arith.constant 0 : index
    %23 = vector.load %arg3[%c2_16, %c0_17] : memref<4x128xf32, #tpu.memory_space<vmem>>, vector<1x128xf32>
    %24 = vector.broadcast %23 : vector<1x128xf32> to vector<32x128xf32>
    %25 = arith.addf %22, %24 : vector<32x128xf32>
    %cst_18 = arith.constant 0.000000e+00 : f32
    %26 = vector.broadcast %cst_18 : f32 to vector<32x128xf32>
    %27 = arith.maximumf %25, %26 : vector<32x128xf32>
    %28 = arith.truncf %27 : vector<32x128xf32> to vector<32x128xbf16>
    %c3 = arith.constant 3 : index
    %c0_19 = arith.constant 0 : index
    %c0_20 = arith.constant 0 : index
    %29 = vector.load %arg2[%c3, %c0_19, %c0_20] : memref<4x128x128xbf16, #tpu.memory_space<vmem>>, vector<1x128x1xbf16>
    %30 = vector.shape_cast %29 : vector<1x128x1xbf16> to vector<128x1xbf16>
    %cst_21 = arith.constant dense<0.000000e+00> : vector<32x1xf32>
    %31 = tpu.matmul %28, %30, %cst_21 {dimension_numbers = #tpu.dot_dimension_numbers<[1], [0], [0], [1], [0, 0, 1, 1], [], []>} : vector<32x128xbf16>, vector<128x1xbf16>, vector<32x1xf32> -> vector<32x1xf32>
    %c3_22 = arith.constant 3 : index
    %c0_23 = arith.constant 0 : index
    %32 = vector.load %arg3[%c3_22, %c0_23] : memref<4x128xf32, #tpu.memory_space<vmem>>, vector<1x1xf32>
    %33 = vector.broadcast %32 : vector<1x1xf32> to vector<32x1xf32>
    %34 = arith.addf %31, %33 : vector<32x1xf32>
    %c0_24 = arith.constant 0 : index
    %c0_25 = arith.constant 0 : index
    %35 = vector.load %arg4[%c0_24, %c0_25] : memref<32x1xf32, #tpu.memory_space<vmem>>, vector<32x1xf32>
    tpu.vector_store %arg4[%c0_24, %c0_25], %34 {strides = array<i32>} : memref<32x1xf32, #tpu.memory_space<vmem>>, vector<32x1xf32>,
    return
  }
  func.func @transform_0(%arg0: i32) -> (i32, i32) {
    %c0_i32 = arith.constant 0 : i32
    %c0_i32_0 = arith.constant 0 : i32
    return %arg0, %c0_i32 : i32, i32
  }
  func.func @transform_1(%arg0: i32) -> (i32, i32, i32) {
    %c0_i32 = arith.constant 0 : i32
    %c0_i32_0 = arith.constant 0 : i32
    %c0_i32_1 = arith.constant 0 : i32
    %c0_i32_2 = arith.constant 0 : i32
    return %c0_i32, %c0_i32_0, %c0_i32_1 : i32, i32, i32
  }
  func.func @transform_2(%arg0: i32) -> (i32, i32) {
    %c0_i32 = arith.constant 0 : i32
    %c0_i32_0 = arith.constant 0 : i32
    %c0_i32_1 = arith.constant 0 : i32
    return %c0_i32, %c0_i32_0 : i32, i32
  }
  func.func @transform_3(%arg0: i32) -> (i32, i32) {
    %c0_i32 = arith.constant 0 : i32
    %c0_i32_0 = arith.constant 0 : i32
    return %arg0, %c0_i32 : i32, i32
  }
}

</mosaic_0001>

<bundles_post_ra>
// kernel: tpu_custom_call.1
= control target key start
LH: loop header
LB: loop body
LE: loop exit
PB: predicated region body
PF: predicated region fallthrough
CT: control target
= control target key end

     0   :  { %8 = vsyncpa [#allocation3], 0  ;;  %s976_s12 = smov 0   ;;  %s1033_s0 = inlined_call_operand.vmem [shape: f32[64,32], index: 0, kind: input, shape index: {}]   ;;  %s1034_s1 = inlined_call_operand.hbm [shape: bf16[4,128,128], index: 1, kind: input, shape index: {}]   ;;  %s1035_s2 = inlined_call_operand.vmem [shape: f32[4,128], index: 2, kind: input, shape index: {}]   ;;  %s1036_s3 = inlined_call_operand.vmem [shape: f32[64,1], index: 3, kind: output, shape index: {}]  }
   0x1 LB: > { %s721_s13 = sadd.s32 4294967295, %s951_s12   ;;  %p723_p0 = scmp.ge.s32.totalorder %s951_s12, 1  ;;  %s951_s12 = sphi %s976_s12, %s14_s12  }
   0x2   : > { %p113_p1 = scmp.lt.s32.totalorder %s951_s12, 3  ;;  %s953_s14 = smov [#allocation2]  }
   0x3   : > { %s125_s15 = sshll.u32 %s953_s14, 4  ;;  %p988_p3 = scmp.eq.s32.totalorder %s721_s13, 0  ;;  %s126_s15 = int_to_ptr.vmem [resolvable:$true] %s125_s15 }
   0x4   : > { %p984_p2 = pnand %p723_p0, %p113_p1  ;;  %s926_s18 = scalar_lea.vmem %s126_s15, 4096 }
   0x5   : > { %p927_p7 = scmp.ne.s32.totalorder %s126_s15, %s926_s18  ;;  %p934_p10 = scmp.lt.s32.totalorder %s126_s15, %s126_s15 }
   0x6   : > { %p872_p4 = pneg %p984_p2  ;;  %p935_p11 = scmp.lt.s32.totalorder %s926_s18, %s926_s18 }
   0x8   : > { %p873_p5 = pnand %p988_p3, %p872_p4  ;;  %p936_p12 = por %p935_p11, %p934_p10 }
   0xa   : > { %p917_p6 = pneg %p873_p5 }
   0xc   : > { %p929_p8 = pnand %p927_p7, %p917_p6 }
   0xe   : > { %p930_p9 = pneg %p929_p8 }
  0x10   : > { %p937_p13 = pnand %p936_p12, %p930_p9 }
  0x12   : > { %940 = shalt.err (!%p937_p13)
}
  0x13   : > { %s954_s19 = smov 64   ;;  %s955_s20 = smov 4  }
  0x14   : > { %875 = dma.hbm_to_vmem [thread:$0]  (!%p873_p5), %s1034_s1, 4096, %s126_s15, [#allocation3], %s954_s19, %s954_s19, %s955_s20  }
  0x15   : > { %153 = sbr.rel (%p984_p2) target bundleno = 857 (0x359), region = 32 }
  0x1a   : > { %946 = dma.done.wait (%p988_p3), [#allocation3], 4096  }
  0x1b   : > { %948 = vsyncadd (%p988_p3), [#allocation3], 4294963200  ;;  %s728_s23 = sshll.u32 %s721_s13, 2  ;;  %v889_v0 = vld [vmem:[#allocation2 + $0x8] sm:$0xff]   ;;  %v890_v1 = vld [vmem:[#allocation2] sm:$0xff]   ;;  %vm217_vm0 = vcmask 261120  }
  0x1c   : > { %p178_p0 = scmp.lt.s32.totalorder %s728_s23, 7  ;;  %800 = vmatprep.subr.bf16.mxu0 %v889_v0  ;;  %v891_v7 = vld [vmem:[#allocation2 + $0x78] sm:$0xff]   ;;  %v892_v8 = vld [vmem:[#allocation2 + $0x70] sm:$0xff]   ;;  %v893_v10 = vld [vmem:[#allocation2 + $0x68] sm:$0xff]   ;;  %vm648_vm1 = vcmask 7168  }
  0x1d   : > { %801 = vmatpush3.bf16.msra.mxu0 %v889_v0  ;;  %808 = vmatprep.subr.bf16.mxu1 %v891_v7  ;;  %v894_v11 = vld [vmem:[#allocation2 + $0x60] sm:$0xff]   ;;  %v895_v12 = vld [vmem:[#allocation2 + $0x58] sm:$0xff]   ;;  %v896_v13 = vld [vmem:[#allocation2 + $0x50] sm:$0xff]  }
  0x1e   : > { %s1040_s23 = smov (!%p178_p0, %s728_s23), 7  ;;  %802 = vmatprep.subr.bf16.mxu0 %v890_v1  ;;  %809 = vmatpush3.bf16.msra.mxu1 %v891_v7  ;;  %v897_v14 = vld [vmem:[#allocation2 + $0x48] sm:$0xff]   ;;  %v898_v15 = vld [vmem:[#allocation2 + $0x40] sm:$0xff]   ;;  %v899_v16 = vld [vmem:[#allocation2 + $0xb8] sm:$0xff]  }
  0x1f   : > { %s729_s24 = sshll.u32 %s1040_s23, 3  ;;  %810 = vmatprep.subr.bf16.mxu1 %v892_v8  ;;  %v900_v17 = vld [vmem:[#allocation2 + $0xb0] sm:$0xff]   ;;  %v901_v18 = vld [vmem:[#allocation2 + $0xa8] sm:$0xff]   ;;  %v902_v19 = vld [vmem:[#allocation2 + $0xa0] sm:$0xff]  }
  0x20   : > { %s181_s27 = scalar_lea.vmem %s1033_s0, %s729_s24  ;;  %v903_v20 = vld [vmem:[#allocation2 + $0x98] sm:$0xff]   ;;  %v732_v23 = vld [vmem:[%s1035_s2] ss:$0 sm:$0xff]  ;;  %v904_v36 = vld [vmem:[#allocation2 + $0x90] sm:$0xff]   ;;  %s187_s9 = scalar_lea.vmem %s1036_s3, %s729_s24 }
  0x21   : > { %v190_v2 = vld [vmem:[%s181_s27] sm:$0xff]  ;;  %v191_v3 = vld [vmem:[%s181_s27 + $0x8] sm:$0xff]  ;;  %v192_v4 = vld [vmem:[%s181_s27 + $0x10] sm:$0xff]  ;;  %803 = vmatpush3.bf16.msra.mxu0 %v890_v1 }
  0x22   : > { %v194_v5 = vpack.c.bf16 %v191_v3, %v190_v2  ;;  %v193_v6 = vld [vmem:[%s181_s27 + $0x18] sm:$0xff]  ;;  %811 = vmatpush3.bf16.msra.mxu1 %v892_v8  ;;  %828 = vmatprep.subr.bf16.mxu0 %v899_v16  ;;  %v905_v37 = vld [vmem:[#allocation2 + $0x88] sm:$0xff]   ;;  %v906_v38 = vld [vmem:[#allocation2 + $0x80] sm:$0xff]  }
  0x23   : > { %v195_v9 = vpack.c.bf16 %v193_v6, %v192_v4  ;;  %812 = vmatprep.subr.bf16.mxu1 %v893_v10  ;;  %v907_v39 = vld [vmem:[#allocation2 + $0xf8] sm:$0xff]   ;;  %v908_v40 = vld [vmem:[#allocation2 + $0xf0] sm:$0xff]   ;;  %v909_v41 = vld [vmem:[#allocation2 + $0xe8] sm:$0xff]  }
  0x24   : > { %804 = vmatprep.mubr.msk.bf16.mxu0 %vm217_vm0, %v194_v5  ;;  %v910_v42 = vld [vmem:[#allocation2 + $0xe0] sm:$0xff]   ;;  %v911_v43 = vld [vmem:[#allocation2 + $0xd8] sm:$0xff]   ;;  %v912_v59 = vld [vmem:[#allocation2 + $0xd0] sm:$0xff]  }
  0x25   : > { %805 = vmatmul.mubr.msk.bf16.vlgmr.msra.gmra.mxu0 %vm217_vm0, %v195_v9  ;;  %v737_v46 = vld [vmem:[%s1035_s2 + $0x1] ss:$0 sm:$0xff]  ;;  %v913_v60 = vld [vmem:[#allocation2 + $0xc8] sm:$0xff]   ;;  %v746_v0 = vld [vmem:[%s1035_s2 + $0x2] ss:$0 sm:$0xff] }
  0x26   : > { %813 = vmatpush3.bf16.msra.mxu1 %v893_v10  ;;  %829 = vmatpush3.bf16.msra.mxu0 %v899_v16  ;;  %v914_v61 = vld [vmem:[#allocation2 + $0xc0] sm:$0xff]  }
  0x27   : > { %814 = vmatprep.subr.bf16.mxu1 %v894_v11  ;;  %830 = vmatprep.subr.bf16.mxu0 %v900_v17 }
  0x2a   : > { %815 = vmatpush3.bf16.msra.mxu1 %v894_v11  ;;  %831 = vmatpush3.bf16.msra.mxu0 %v900_v17 }
  0x2b   : > { %816 = vmatprep.subr.bf16.mxu1 %v895_v12  ;;  %832 = vmatprep.subr.bf16.mxu0 %v901_v18 }
  0x2e   : > { %817 = vmatpush3.bf16.msra.mxu1 %v895_v12  ;;  %833 = vmatpush3.bf16.msra.mxu0 %v901_v18 }
  0x2f   : > { %818 = vmatprep.subr.bf16.mxu1 %v896_v13  ;;  %834 = vmatprep.subr.bf16.mxu0 %v902_v19 }
  0x32   : > { %819 = vmatpush3.bf16.msra.mxu1 %v896_v13  ;;  %835 = vmatpush3.bf16.msra.mxu0 %v902_v19 }
  0x33   : > { %820 = vmatprep.subr.bf16.mxu1 %v897_v14  ;;  %836 = vmatprep.subr.bf16.mxu0 %v903_v20 }
  0x36   : > { %821 = vmatpush3.bf16.msra.mxu1 %v897_v14  ;;  %837 = vmatpush3.bf16.msra.mxu0 %v903_v20  ;;  %v755_v14 = vld [vmem:[%s1035_s2 + $0x3] ss:$0 sm:$0xff] }
  0x37   : > { %822 = vmatprep.subr.bf16.mxu1 %v898_v15  ;;  %838 = vmatprep.subr.bf16.mxu0 %v904_v36 }
  0x3a   : > { %823 = vmatpush3.bf16.msra.mxu1 %v898_v15  ;;  %839 = vmatpush3.bf16.msra.mxu0 %v904_v36 }
  0x3b   : > { %840 = vmatprep.subr.bf16.mxu0 %v905_v37  ;;  %848 = vmatprep.subr.bf16.mxu1 %v907_v39 }
  0x3e   : > { %841 = vmatpush3.bf16.msra.mxu0 %v905_v37 }
  0x3f   : > { %842 = vmatprep.subr.bf16.mxu0 %v906_v38 }
  0x42   : > { %843 = vmatpush3.bf16.msra.mxu0 %v906_v38 }
  0xe5   : > { %v806_v21 = vpop.f32.mrf.mxu0 }
  0xe6   : > { %v267_v27 = vadd.f32 %v806_v21, %v732_v23 }
  0xe7   : > { %v258_v22 = vpop.f32.mrf.mxu0 }
  0xe8   : > { %v259_v25 = vadd.f32 %v732_v23, %v258_v22  ;;  %v275_v33 = vmax.f32 %v267_v27, 0.0 }
  0xe9   : > { %v807_v24 = vpop.f32.mrf.mxu0 }
  0xea   : > { %v270_v26 = vadd.f32 %v807_v24, %v732_v23  ;;  %v273_v31 = vmax.f32 %v259_v25, 0.0 }
  0xeb   : > { %v261_v28 = vpop.f32.mrf.mxu0 }
  0xec   : > { %v262_v29 = vadd.f32 %v732_v23, %v261_v28  ;;  %v276_v30 = vmax.f32 %v270_v26, 0.0 }
  0xee   : > { %v274_v32 = vmax.f32 %v262_v29, 0.0  ;;  %v278_v35 = vpack.c.bf16 %v276_v30, %v275_v33 }
  0xf0   : > { %v277_v34 = vpack.c.bf16 %v274_v32, %v273_v31 }
  0xf2   : > { %824 = vmatprep.mubr.bf16.mxu1 %v277_v34 }
  0xf3   : > { %825 = vmatmul.mubr.bf16.vlgmr.msra.gmra.mxu1 %v278_v35 }
  0xf4   : > { %849 = vmatpush3.bf16.msra.mxu1 %v907_v39 }
  0xf5   : > { %850 = vmatprep.subr.bf16.mxu1 %v908_v40 }
  0xf8   : > { %851 = vmatpush3.bf16.msra.mxu1 %v908_v40 }
  0xf9   : > { %852 = vmatprep.subr.bf16.mxu1 %v909_v41 }
  0xfc   : > { %853 = vmatpush3.bf16.msra.mxu1 %v909_v41 }
  0xfd   : > { %854 = vmatprep.subr.bf16.mxu1 %v910_v42 }
 0x100   : > { %855 = vmatpush3.bf16.msra.mxu1 %v910_v42 }
 0x101   : > { %856 = vmatprep.subr.bf16.mxu1 %v911_v43 }
 0x104   : > { %857 = vmatpush3.bf16.msra.mxu1 %v911_v43 }
 0x105   : > { %858 = vmatprep.subr.bf16.mxu1 %v912_v59 }
 0x108   : > { %859 = vmatpush3.bf16.msra.mxu1 %v912_v59 }
 0x109   : > { %860 = vmatprep.subr.bf16.mxu1 %v913_v60 }
 0x10c   : > { %861 = vmatpush3.bf16.msra.mxu1 %v913_v60 }
 0x10d   : > { %862 = vmatprep.subr.bf16.mxu1 %v914_v61 }
 0x110   : > { %863 = vmatpush3.bf16.msra.mxu1 %v914_v61 }
 0x1b3   : > { %v826_v44 = vpop.f32.mrf.mxu1 }
 0x1b4   : > { %v392_v50 = vadd.f32 %v826_v44, %v737_v46 }
 0x1b5   : > { %v383_v45 = vpop.f32.mrf.mxu1 }
 0x1b6   : > { %v384_v48 = vadd.f32 %v737_v46, %v383_v45  ;;  %v400_v56 = vmax.f32 %v392_v50, 0.0 }
 0x1b7   : > { %v827_v47 = vpop.f32.mrf.mxu1 }
 0x1b8   : > { %v395_v49 = vadd.f32 %v827_v47, %v737_v46  ;;  %v398_v54 = vmax.f32 %v384_v48, 0.0 }
 0x1b9   : > { %v386_v51 = vpop.f32.mrf.mxu1 }
 0x1ba   : > { %v387_v52 = vadd.f32 %v737_v46, %v386_v51  ;;  %v401_v53 = vmax.f32 %v395_v49, 0.0 }
 0x1bc   : > { %v399_v55 = vmax.f32 %v387_v52, 0.0  ;;  %v403_v58 = vpack.c.bf16 %v401_v53, %v400_v56 }
 0x1be   : > { %v402_v57 = vpack.c.bf16 %v399_v55, %v398_v54 }
 0x1c0   : > { %844 = vmatprep.mubr.bf16.mxu0 %v402_v57 }
 0x1c1   : > { %845 = vmatmul.mubr.bf16.vlgmr.msra.gmra.mxu0 %v403_v58 }
 0x281   : > { %v846_v62 = vpop.f32.mrf.mxu0 }
 0x282   : > { %v517_v4 = vadd.f32 %v846_v62, %v746_v0 }
 0x283   : > { %v508_v63 = vpop.f32.mrf.mxu0 }
 0x284   : > { %v509_v2 = vadd.f32 %v746_v0, %v508_v63  ;;  %v525_v10 = vmax.f32 %v517_v4, 0.0 }
 0x285   : > { %v847_v1 = vpop.f32.mrf.mxu0 }
 0x286   : > { %v520_v3 = vadd.f32 %v847_v1, %v746_v0  ;;  %v523_v8 = vmax.f32 %v509_v2, 0.0 }
 0x287   : > { %v511_v5 = vpop.f32.mrf.mxu0 }
 0x288   : > { %v512_v6 = vadd.f32 %v746_v0, %v511_v5  ;;  %v526_v7 = vmax.f32 %v520_v3, 0.0 }
 0x28a   : > { %v524_v9 = vmax.f32 %v512_v6, 0.0  ;;  %v528_v12 = vpack.c.bf16 %v526_v7, %v525_v10 }
 0x28c   : > { %v527_v11 = vpack.c.bf16 %v524_v9, %v523_v8 }
 0x28e   : > { %864 = vmatprep.mubr.bf16.mxu1 %v527_v11 }
 0x28f   : > { %865 = vmatmul.mubr.bf16.vlgmr.msra.gmra.mxu1 %v528_v12 }
 0x34f   : > { %v866_v13 = vpop.f32.mrf.mxu1 }
 0x350   : > { %v642_v20 = vadd.f32 %v866_v13, %v755_v14 }
 0x351   : > { %v633_v15 = vpop.f32.mrf.mxu1 }
 0x352   : > { %v634_v16 = vadd.f32 %v755_v14, %v633_v15  ;;  %651 = vst.msk [vmem:[%s187_s9 + $0x10] sm:$0xff] %vm648_vm1, %v642_v20 }
 0x353   : > { %v867_v17 = vpop.f32.mrf.mxu1 }
 0x354   : > { %649 = vst.msk [vmem:[%s187_s9] sm:$0xff] %vm648_vm1, %v634_v16  ;;  %v645_v21 = vadd.f32 %v867_v17, %v755_v14 }
 0x355   : > { %v636_v18 = vpop.f32.mrf.mxu1 }
 0x356   : > { %v637_v19 = vadd.f32 %v755_v14, %v636_v18  ;;  %652 = vst.msk [vmem:[%s187_s9 + $0x18] sm:$0xff] %vm648_vm1, %v645_v21 }
 0x358   : > { %650 = vst.msk [vmem:[%s187_s9 + $0x8] sm:$0xff] %vm648_vm1, %v637_v19 }
 0x359 PF: > { %s14_s12 = sadd.s32 1, %s951_s12  }
 0x35a   : > { %p11_p1 = scmp.ge.s32.totalorder %s14_s12, 4  }
 0x35c   :  { %13 = sbr.rel (!%p11_p1) target bundleno = 1 (0x1), region = 70 }
 0x361   :  { %675 = vsyncpa [#allocation3], 1 }
 0x362   :  { %677 = vsyncpa [#allocation3 + $0x1], 1 }

</bundles_post_ra>
